<compile_context>
chip_gen: v7x
topology: tpu7x:2x2x1
jax: 0.10.0
libtpu: 0.0.40
codegen_flags: <defaults>
</compile_context>

<pallas_src>
import jax
import jax.numpy as jnp
from jax import lax
from jax.experimental import pallas as pl
from jax.experimental.pallas import tpu as pltpu


def recommender_kernel(
    x_ref,                      # (TILE_B, 32)  concat([user_emb, movie_emb])
    wud_ref, bud_ref,           # fused fc_u/fc_m: block-diag (32, 32), (1, 32)
    w1_ref, b1_ref,             # fc1: (32, 32), (1, 32)
    w2_ref, b2_ref,             # fc2: (32, 32), (1, 32)
    w3_ref,                     # fc3 weight as a row: (1, 32)
    b3_ref,                     # fc3 bias, scalar in SMEM: (1,)
    out_ref,                    # (1, TILE_B)  lane-dense sigmoid output
):
    x = x_ref[...]

    # fc_u / fc_m fused via block-diagonal weight on the concatenated slab.
    um = jnp.dot(x, wud_ref[...], preferred_element_type=jnp.float32) + bud_ref[...]

    # fc1 (dropout = identity), keep pre-ReLU value as the residual.
    h1 = jnp.dot(um, w1_ref[...], preferred_element_type=jnp.float32) + b1_ref[...]

    # relu ; fc2 ; + residual ; relu
    h = jnp.maximum(h1, 0.0)
    h2 = jnp.dot(h, w2_ref[...], preferred_element_type=jnp.float32) + b2_ref[...] + h1
    h = jnp.maximum(h2, 0.0)

    # fc3 computed directly in lane-dense form:
    #   (1, 32) contracted against (TILE_B, 32) on the 32-axis -> (1, TILE_B).
    o = lax.dot_general(
        w3_ref[...], h,
        dimension_numbers=(((1,), (1,)), ((), ())),
        preferred_element_type=jnp.float32,
    )
    out_ref[...] = jax.nn.sigmoid(o + b3_ref[0])


def _round_up(x, m):
    return pl.cdiv(x, m) * m


def residual_recommender_forward(user_id, movie_id, params, tile_b_max=1024):
    # Embedding gathers are index glue — done in plain JAX (rows are only
    # 64 B each, far below the size where an in-kernel DMA gather pays off).
    ue = params["user_emb"][user_id]                 # (B, Eu)
    me = params["movie_emb"][movie_id]               # (B, Em)
    x = jnp.concatenate([ue, me], axis=1).astype(jnp.float32)   # (B, 32)
    B, F = x.shape

    # Batch tiling: TILE_B rows per grid step, multiple of 128 lanes for the
    # lane-dense output; pad the batch up to a whole number of tiles.
    tile_b = min(int(tile_b_max), int(_round_up(B, 128)))
    b_pad = int(_round_up(B, tile_b))
    if b_pad != B:
        x = jnp.pad(x, ((0, b_pad - B), (0, 0)))
    num_tiles = b_pad // tile_b

    wud, bud = params["wud"], params["bud"]
    w1, b1 = params["w1"], params["b1"]
    w2, b2 = params["w2"], params["b2"]
    w3, b3 = params["w3"], params["b3"]

    # Weights / biases: full-array blocks with constant index maps — they are
    # DMA'd once and stay VMEM-resident across the batch grid.
    const2d = lambda a: pl.BlockSpec(a.shape, lambda i: (0, 0))

    # VMEM budget: double-buffered input tiles (32 lanes pad to 128) +
    # double-buffered output rows + weights + headroom.
    vmem_bytes = (
        2 * tile_b * 128 * 4        # x tiles
        + 2 * 8 * tile_b * 4        # output rows (sublane-padded to 8)
        + 8 * 8 * 128 * 4           # weights & biases (each padded)
        + (4 << 20)                 # headroom / internal scratch
    )
    vmem_bytes = int(min(max(vmem_bytes, 8 << 20), 32 << 20))

    out = pl.pallas_call(
        recommender_kernel,
        out_shape=jax.ShapeDtypeStruct((1, b_pad), jnp.float32),
        grid=(num_tiles,),
        in_specs=[
            pl.BlockSpec((tile_b, F), lambda i: (i, 0)),        # x: batch-tiled
            const2d(wud), const2d(bud),
            const2d(w1), const2d(b1),
            const2d(w2), const2d(b2),
            const2d(w3),
            pl.BlockSpec(memory_space=pltpu.MemorySpace.SMEM),  # b3 scalar
        ],
        out_specs=pl.BlockSpec((1, tile_b), lambda i: (0, i)),  # lane-dense
        compiler_params=pltpu.CompilerParams(
            dimension_semantics=("parallel",),
            vmem_limit_bytes=vmem_bytes,
        ),
    )(x, wud, bud, w1, b1, w2, b2, w3, b3)

    return out[0, :B].reshape(B, 1)


def init_params(key, user_count, movie_count, eu, em, hidden=32):
    ks = jax.random.split(key, 7)

    def xavier(k, shape):
        fan_out, fan_in = shape
        a = jnp.sqrt(6.0 / (fan_in + fan_out))
        return jax.random.uniform(k, shape, jnp.float32, -a, a)

    def linear(k, in_f, out_f):
        # torch nn.Linear layout: W (out, in), b (out,)
        kw, kb = jax.random.split(k)
        bound = 1.0 / jnp.sqrt(in_f)
        w = jax.random.uniform(kw, (out_f, in_f), jnp.float32, -bound, bound)
        b = jax.random.uniform(kb, (out_f,), jnp.float32, -bound, bound)
        return w, b

    wu, bu = linear(ks[2], eu, eu)
    wm, bm = linear(ks[3], em, em)
    w1, b1 = linear(ks[4], eu + em, hidden)
    w2, b2 = linear(ks[5], hidden, hidden)
    w3, b3 = linear(ks[6], hidden, 1)

    # Fuse fc_u / fc_m into a single block-diagonal weight acting on
    # x = concat([ue, me], 1); pre-transpose every Linear weight to (in, out).
    f = eu + em
    wud = jnp.zeros((f, f), jnp.float32)
    wud = wud.at[:eu, :eu].set(wu.T).at[eu:, eu:].set(wm.T)
    bud = jnp.concatenate([bu, bm]).reshape(1, f)

    return {
        "user_emb": xavier(ks[0], (user_count, eu)),
        "movie_emb": xavier(ks[1], (movie_count, em)),
        "wud": wud, "bud": bud,
        "w1": w1.T, "b1": b1.reshape(1, hidden),
        "w2": w2.T, "b2": b2.reshape(1, hidden),
        "w3": w3,                   # (1, hidden); kernel contracts its last dim
        "b3": b3.reshape(1),        # scalar bias, lives in SMEM
    }


def reference_forward(user_id, movie_id, params):
    # Pure-JAX reference with identical semantics (dropout = identity).
    ue = params["user_emb"][user_id]
    me = params["movie_emb"][movie_id]
    x = jnp.concatenate([ue, me], axis=1)
    um = x @ params["wud"] + params["bud"]
    h1 = um @ params["w1"] + params["b1"]
    h = jnp.maximum(h1, 0.0)
    h2 = h @ params["w2"] + params["b2"] + h1
    h = jnp.maximum(h2, 0.0)
    o = h @ params["w3"].T + params["b3"]
    return jax.nn.sigmoid(o)


if __name__ == "__main__":
    key = jax.random.PRNGKey(0)
    USER_COUNT, MOVIE_COUNT = 64, 128
    EU, EM = 16, 16
    B = 8

    k_params, k_u, k_m = jax.random.split(key, 3)
    params = init_params(k_params, USER_COUNT, MOVIE_COUNT, EU, EM)

    user_id = jax.random.randint(k_u, (B,), 0, USER_COUNT)
    movie_id = jax.random.randint(k_m, (B,), 0, MOVIE_COUNT)

    out = residual_recommender_forward(user_id, movie_id, params)
    out = jax.block_until_ready(out)

    ref = reference_forward(user_id, movie_id, params)
    assert out.shape == (B, 1)
    assert bool(jnp.allclose(out, ref, atol=2e-5, rtol=1e-4)), (
        f"max abs err {float(jnp.max(jnp.abs(out - ref)))}"
    )

    print("KERNEL_OK")
</pallas_src>

<mosaic_0001>
module attributes {stable_mosaic.version = 11 : i64} {
  func.func @recommender_kernel(%arg0: i32, %arg1: memref<128x32xf32, #tpu.memory_space<vmem>>, %arg2: memref<32x32xf32, #tpu.memory_space<vmem>>, %arg3: memref<1x32xf32, #tpu.memory_space<vmem>>, %arg4: memref<32x32xf32, #tpu.memory_space<vmem>>, %arg5: memref<1x32xf32, #tpu.memory_space<vmem>>, %arg6: memref<32x32xf32, #tpu.memory_space<vmem>>, %arg7: memref<1x32xf32, #tpu.memory_space<vmem>>, %arg8: memref<1x32xf32, #tpu.memory_space<vmem>>, %arg9: memref<1xf32, #tpu.memory_space<smem>>, %arg10: memref<1x128xf32, #tpu.memory_space<vmem>>) attributes {dimension_semantics = [#tpu.dimension_semantics<parallel>], iteration_bounds = array<i64: 1>, scalar_prefetch = 0 : i64, scratch_operands = 0 : i64, tpu.core_type = #tpu.core_type<tc>, window_params = [{transform_indices = @transform_0, window_bounds = array<i64: 128, 32>}, {pipeline_mode = #tpu.pipeline_mode<synchronous>, transform_indices = @transform_1, window_bounds = array<i64: 32, 32>}, {pipeline_mode = #tpu.pipeline_mode<synchronous>, transform_indices = @transform_2, window_bounds = array<i64: 1, 32>}, {pipeline_mode = #tpu.pipeline_mode<synchronous>, transform_indices = @transform_3, window_bounds = array<i64: 32, 32>}, {pipeline_mode = #tpu.pipeline_mode<synchronous>, transform_indices = @transform_4, window_bounds = array<i64: 1, 32>}, {pipeline_mode = #tpu.pipeline_mode<synchronous>, transform_indices = @transform_5, window_bounds = array<i64: 32, 32>}, {pipeline_mode = #tpu.pipeline_mode<synchronous>, transform_indices = @transform_6, window_bounds = array<i64: 1, 32>}, {pipeline_mode = #tpu.pipeline_mode<synchronous>, transform_indices = @transform_7, window_bounds = array<i64: 1, 32>}, {transform_indices = @transform_8, window_bounds = array<i64: 1>}, {transform_indices = @transform_9, window_bounds = array<i64: 1, 128>}]} {
    %c0 = arith.constant 0 : index
    %c0_0 = arith.constant 0 : index
    %0 = vector.load %arg1[%c0, %c0_0] : memref<128x32xf32, #tpu.memory_space<vmem>>, vector<128x32xf32>
    %c0_1 = arith.constant 0 : index
    %c0_2 = arith.constant 0 : index
    %1 = vector.load %arg2[%c0_1, %c0_2] : memref<32x32xf32, #tpu.memory_space<vmem>>, vector<32x32xf32>
    %cst = arith.constant dense<0.000000e+00> : vector<128x32xf32>
    %2 = tpu.matmul %0, %1, %cst {dimension_numbers = #tpu.dot_dimension_numbers<[1], [0], [0], [1], [0, 0, 1, 1], [], []>} : vector<128x32xf32>, vector<32x32xf32>, vector<128x32xf32> -> vector<128x32xf32>
    %c0_3 = arith.constant 0 : index
    %c0_4 = arith.constant 0 : index
    %3 = vector.load %arg3[%c0_3, %c0_4] : memref<1x32xf32, #tpu.memory_space<vmem>>, vector<1x32xf32>
    %4 = vector.broadcast %3 : vector<1x32xf32> to vector<128x32xf32>
    %5 = arith.addf %2, %4 : vector<128x32xf32>
    %c0_5 = arith.constant 0 : index
    %c0_6 = arith.constant 0 : index
    %6 = vector.load %arg4[%c0_5, %c0_6] : memref<32x32xf32, #tpu.memory_space<vmem>>, vector<32x32xf32>
    %cst_7 = arith.constant dense<0.000000e+00> : vector<128x32xf32>
    %7 = tpu.matmul %5, %6, %cst_7 {dimension_numbers = #tpu.dot_dimension_numbers<[1], [0], [0], [1], [0, 0, 1, 1], [], []>} : vector<128x32xf32>, vector<32x32xf32>, vector<128x32xf32> -> vector<128x32xf32>
    %c0_8 = arith.constant 0 : index
    %c0_9 = arith.constant 0 : index
    %8 = vector.load %arg5[%c0_8, %c0_9] : memref<1x32xf32, #tpu.memory_space<vmem>>, vector<1x32xf32>
    %9 = vector.broadcast %8 : vector<1x32xf32> to vector<128x32xf32>
    %10 = arith.addf %7, %9 : vector<128x32xf32>
    %cst_10 = arith.constant 0.000000e+00 : f32
    %11 = vector.broadcast %cst_10 : f32 to vector<128x32xf32>
    %12 = arith.maximumf %10, %11 : vector<128x32xf32>
    %c0_11 = arith.constant 0 : index
    %c0_12 = arith.constant 0 : index
    %13 = vector.load %arg6[%c0_11, %c0_12] : memref<32x32xf32, #tpu.memory_space<vmem>>, vector<32x32xf32>
    %cst_13 = arith.constant dense<0.000000e+00> : vector<128x32xf32>
    %14 = tpu.matmul %12, %13, %cst_13 {dimension_numbers = #tpu.dot_dimension_numbers<[1], [0], [0], [1], [0, 0, 1, 1], [], []>} : vector<128x32xf32>, vector<32x32xf32>, vector<128x32xf32> -> vector<128x32xf32>
    %c0_14 = arith.constant 0 : index
    %c0_15 = arith.constant 0 : index
    %15 = vector.load %arg7[%c0_14, %c0_15] : memref<1x32xf32, #tpu.memory_space<vmem>>, vector<1x32xf32>
    %16 = vector.broadcast %15 : vector<1x32xf32> to vector<128x32xf32>
    %17 = arith.addf %14, %16 : vector<128x32xf32>
    %18 = arith.addf %17, %10 : vector<128x32xf32>
    %cst_16 = arith.constant 0.000000e+00 : f32
    %19 = vector.broadcast %cst_16 : f32 to vector<128x32xf32>
    %20 = arith.maximumf %18, %19 : vector<128x32xf32>
    %c0_17 = arith.constant 0 : index
    %c0_18 = arith.constant 0 : index
    %21 = vector.load %arg8[%c0_17, %c0_18] : memref<1x32xf32, #tpu.memory_space<vmem>>, vector<1x32xf32>
    %cst_19 = arith.constant dense<0.000000e+00> : vector<1x128xf32>
    %22 = tpu.matmul %21, %20, %cst_19 {dimension_numbers = #tpu.dot_dimension_numbers<[1], [1], [0], [0], [0, 0, 1, 0], [], []>} : vector<1x32xf32>, vector<128x32xf32>, vector<1x128xf32> -> vector<1x128xf32>
    %c0_20 = arith.constant 0 : index
    %23 = memref.load %arg9[%c0_20] : memref<1xf32, #tpu.memory_space<smem>>
    %24 = vector.broadcast %23 : f32 to vector<1x128xf32>
    %25 = arith.addf %22, %24 : vector<1x128xf32>
    %26 = arith.negf %25 : vector<1x128xf32>
    %27 = math.exp %26 : vector<1x128xf32>
    %cst_21 = arith.constant 1.000000e+00 : f32
    %28 = vector.broadcast %cst_21 : f32 to vector<1x128xf32>
    %29 = arith.addf %28, %27 : vector<1x128xf32>
    %30 = arith.divf %28, %29 : vector<1x128xf32>
    %c0_22 = arith.constant 0 : index
    %c0_23 = arith.constant 0 : index
    %31 = vector.load %arg10[%c0_22, %c0_23] : memref<1x128xf32, #tpu.memory_space<vmem>>, vector<1x128xf32>
    tpu.vector_store %arg10[%c0_22, %c0_23], %30 {strides = array<i32>} : memref<1x128xf32, #tpu.memory_space<vmem>>, vector<1x128xf32>,
    return
  }
  func.func @transform_0(%arg0: i32) -> (i32, i32) {
    %c0_i32 = arith.constant 0 : i32
    %c0_i32_0 = arith.constant 0 : i32
    return %arg0, %c0_i32 : i32, i32
  }
  func.func @transform_1(%arg0: i32) -> (i32, i32) {
    %c0_i32 = arith.constant 0 : i32
    %c0_i32_0 = arith.constant 0 : i32
    %c0_i32_1 = arith.constant 0 : i32
    return %c0_i32, %c0_i32_0 : i32, i32
  }
  func.func @transform_2(%arg0: i32) -> (i32, i32) {
    %c0_i32 = arith.constant 0 : i32
    %c0_i32_0 = arith.constant 0 : i32
    %c0_i32_1 = arith.constant 0 : i32
    return %c0_i32, %c0_i32_0 : i32, i32
  }
  func.func @transform_3(%arg0: i32) -> (i32, i32) {
    %c0_i32 = arith.constant 0 : i32
    %c0_i32_0 = arith.constant 0 : i32
    %c0_i32_1 = arith.constant 0 : i32
    return %c0_i32, %c0_i32_0 : i32, i32
  }
  func.func @transform_4(%arg0: i32) -> (i32, i32) {
    %c0_i32 = arith.constant 0 : i32
    %c0_i32_0 = arith.constant 0 : i32
    %c0_i32_1 = arith.constant 0 : i32
    return %c0_i32, %c0_i32_0 : i32, i32
  }
  func.func @transform_5(%arg0: i32) -> (i32, i32) {
    %c0_i32 = arith.constant 0 : i32
    %c0_i32_0 = arith.constant 0 : i32
    %c0_i32_1 = arith.constant 0 : i32
    return %c0_i32, %c0_i32_0 : i32, i32
  }
  func.func @transform_6(%arg0: i32) -> (i32, i32) {
    %c0_i32 = arith.constant 0 : i32
    %c0_i32_0 = arith.constant 0 : i32
    %c0_i32_1 = arith.constant 0 : i32
    return %c0_i32, %c0_i32_0 : i32, i32
  }
  func.func @transform_7(%arg0: i32) -> (i32, i32) {
    %c0_i32 = arith.constant 0 : i32
    %c0_i32_0 = arith.constant 0 : i32
    %c0_i32_1 = arith.constant 0 : i32
    return %c0_i32, %c0_i32_0 : i32, i32
  }
  func.func @transform_8(%arg0: i32) -> i32 {
    %c0_i32 = arith.constant 0 : i32
    %c0_i32_0 = arith.constant 0 : i32
    return %c0_i32 : i32
  }
  func.func @transform_9(%arg0: i32) -> (i32, i32) {
    %c0_i32 = arith.constant 0 : i32
    %c0_i32_0 = arith.constant 0 : i32
    return %c0_i32, %arg0 : i32, i32
  }
}

</mosaic_0001>

<bundles_post_ra>
// kernel: tpu_custom_call.1
= control target key start
LH: loop header
LB: loop body
LE: loop exit
PB: predicated region body
PF: predicated region fallthrough
CT: control target
= control target key end

     0   :  { %vm61_vm0 = vcmask 261120   ;;  %s1547_s0 = inlined_call_operand.vmem [shape: f32[128,32], index: 0, kind: input, shape index: {}]   ;;  %s1548_s1 = inlined_call_operand.vmem [shape: f32[32,32], index: 1, kind: input, shape index: {}]   ;;  %s1549_s2 = inlined_call_operand.vmem [shape: f32[1,32], index: 2, kind: input, shape index: {}]   ;;  %s1550_s3 = inlined_call_operand.vmem [shape: f32[32,32], index: 3, kind: input, shape index: {}]   ;;  %s1551_s4 = inlined_call_operand.vmem [shape: f32[1,32], index: 4, kind: input, shape index: {}]   ;;  %s1552_s5 = inlined_call_operand.vmem [shape: f32[32,32], index: 5, kind: input, shape index: {}]   ;;  %s1553_s6 = inlined_call_operand.vmem [shape: f32[1,32], index: 6, kind: input, shape index: {}]   ;;  %s1554_s7 = inlined_call_operand.vmem [shape: f32[1,32], index: 7, kind: input, shape index: {}]   ;;  %s1555_s8 = inlined_call_operand.<no memory space> [shape: f32[1], index: 8, kind: input, shape index: {}]   ;;  %s1556_s9 = inlined_call_operand.hbm [shape: f32[1,128], index: 9, kind: output, shape index: {}]  }
   0x1   :  { %v50_v0 = vld [vmem:[%s1548_s1] sm:$0xff]  ;;  %v51_v1 = vld [vmem:[%s1548_s1 + $0x8] sm:$0xff]  ;;  %v52_v2 = vld [vmem:[%s1548_s1 + $0x10] sm:$0xff] }
   0x2   :  { %v1133_v3 = vpack.c.bf16 %v51_v1, %v50_v0  ;;  %v53_v4 = vld [vmem:[%s1548_s1 + $0x18] sm:$0xff]  ;;  %v34_v5 = vld [vmem:[%s1547_s0] sm:$0xff]  ;;  %v256_v8 = vld [vmem:[%s1550_s3 + $0x8] sm:$0xff] }
   0x3   :  { %v1137_v6 = vpack.c.bf16 %v53_v4, %v52_v2  ;;  %1010 = vmatprep.mubr.msk.f32.mxu0 %vm61_vm0, %v34_v5  ;;  %v255_v7 = vld [vmem:[%s1550_s3] sm:$0xff] }
   0x4   :  { %1134 = vmatprep.subr.bf16.mxu0 %v1133_v3 }
   0x5   :  { %1136 = vmatpush3.bf16.msra.mxu0 %v1133_v3 }
   0x6   :  { %1138 = vmatprep.subr.bf16.mxu0 %v1137_v6 }
   0x7   :  { %15 = vsyncpa [#allocation4], 0  ;;  %v35_v9 = vld [vmem:[%s1547_s0 + $0x8] sm:$0xff]  ;;  %v1141_v10 = vpack.c.bf16 %v256_v8, %v255_v7  ;;  %v36_v11 = vld [vmem:[%s1547_s0 + $0x10] sm:$0xff]  ;;  %vm1222_vm1 = vmmov 0   ;;  %s1224_s24 = smov [#allocation3]  }
   0x8   :  { %v37_v12 = vld [vmem:[%s1547_s0 + $0x18] sm:$0xff]  ;;  %v38_v13 = vld [vmem:[%s1547_s0 + $0x20] sm:$0xff]  ;;  %v39_v14 = vld [vmem:[%s1547_s0 + $0x28] sm:$0xff]  ;;  %s848_s25 = sshll.u32 %s1224_s24, 4  ;;  %s849_s25 = int_to_ptr.vmem [resolvable:$true] %s848_s25 }
   0x9   :  { %1140 = vmatpush3.bf16.msra.mxu0 %v1137_v6  ;;  %1142 = vmatprep.subr.bf16.mxu1 %v1141_v10  ;;  %v40_v15 = vld [vmem:[%s1547_s0 + $0x30] sm:$0xff]  ;;  %v41_v16 = vld [vmem:[%s1547_s0 + $0x38] sm:$0xff]  ;;  %v42_v17 = vld [vmem:[%s1547_s0 + $0x40] sm:$0xff]  ;;  %s1201_s26 = scalar_lea.vmem %s849_s25, 32  ;;  %p1202_p1 = scmp.lt.s32.totalorder %s849_s25, %s849_s25 }
   0xa   :  { %1144 = vmatpush3.bf16.msra.mxu1 %v1141_v10  ;;  %v43_v18 = vld [vmem:[%s1547_s0 + $0x48] sm:$0xff]  ;;  %v44_v19 = vld [vmem:[%s1547_s0 + $0x50] sm:$0xff]  ;;  %v45_v20 = vld [vmem:[%s1547_s0 + $0x58] sm:$0xff] }
   0xb   :  { %v46_v21 = vld [vmem:[%s1547_s0 + $0x60] sm:$0xff]  ;;  %v47_v22 = vld [vmem:[%s1547_s0 + $0x68] sm:$0xff]  ;;  %v48_v23 = vld [vmem:[%s1547_s0 + $0x70] sm:$0xff] }
   0xc   :  { %1011 = vmatmul.mubr.msk.f32.vlgmr.msra.gmra.mrb[0].mxu0 %vm61_vm0, %v35_v9  ;;  %v49_v24 = vld [vmem:[%s1547_s0 + $0x78] sm:$0xff]  ;;  %v257_v25 = vld [vmem:[%s1550_s3 + $0x10] sm:$0xff]  ;;  %v475_v28 = vld [vmem:[%s1552_s5] sm:$0xff] }
   0xd   :  { %1013 = vmatprep.mubr.msk.f32.mxu0 %vm61_vm0, %v36_v11  ;;  %v258_v26 = vld [vmem:[%s1550_s3 + $0x18] sm:$0xff]  ;;  %v476_v29 = vld [vmem:[%s1552_s5 + $0x8] sm:$0xff]  ;;  %v477_v30 = vld [vmem:[%s1552_s5 + $0x10] sm:$0xff] }
   0xe   :  { %v1145_v27 = vpack.c.bf16 %v258_v26, %v257_v25  ;;  %v1149_v31 = vpack.c.bf16 %v476_v29, %v475_v28  ;;  %v478_v32 = vld [vmem:[%s1552_s5 + $0x18] sm:$0xff]  ;;  %v856_v34 = vld [vmem:[%s1549_s2] ss:$0 sm:$0xff]  ;;  %vm1476_vm2 = vmpackc.low %vm61_vm0, %vm61_vm0 }
   0xf   :  { %v1153_v33 = vpack.c.bf16 %v478_v32, %v477_v30  ;;  %v873_v3 = vld [vmem:[%s1551_s4] ss:$0 sm:$0xff] }
  0x10   :  { %1014 = vmatmul.mubr.msk.f32.gmra.mrb[2].mxu0 %vm61_vm0, %v37_v12  ;;  %1146 = vmatprep.subr.bf16.mxu1 %v1145_v27 }
  0x11   :  { %1016 = vmatprep.mubr.msk.f32.mxu0 %vm61_vm0, %v38_v13  ;;  %1148 = vmatpush3.bf16.msra.mxu1 %v1145_v27 }
  0x12   :  { %1150 = vmatprep.subr.bf16.mxu0 %v1149_v31 }
  0x13   :  { %1152 = vmatpush3.bf16.msra.mxu0 %v1149_v31 }
  0x14   :  { %1017 = vmatmul.mubr.msk.f32.gmra.mrb[4].mxu0 %vm61_vm0, %v39_v14  ;;  %1154 = vmatprep.subr.bf16.mxu0 %v1153_v33 }
  0x15   :  { %1019 = vmatprep.mubr.msk.f32.mxu0 %vm61_vm0, %v40_v15 }
  0x17   :  { %1156 = vmatpush3.bf16.msra.mxu0 %v1153_v33 }
  0x18   :  { %1020 = vmatmul.mubr.msk.f32.gmra.mrb[6].mxu0 %vm61_vm0, %v41_v16 }
  0x19   :  { %1022 = vmatprep.mubr.msk.f32.mxu0 %vm61_vm0, %v42_v17 }
  0x1c   :  { %1023 = vmatmul.mubr.msk.f32.gmra.mrb[8].mxu0 %vm61_vm0, %v43_v18 }
  0x1d   :  { %1025 = vmatprep.mubr.msk.f32.mxu0 %vm61_vm0, %v44_v19 }
  0x20   :  { %1026 = vmatmul.mubr.msk.f32.gmra.mrb[10].mxu0 %vm61_vm0, %v45_v20 }
  0x21   :  { %1028 = vmatprep.mubr.msk.f32.mxu0 %vm61_vm0, %v46_v21 }
  0x24   :  { %1029 = vmatmul.mubr.msk.f32.gmra.mrb[12].mxu0 %vm61_vm0, %v47_v22 }
  0x25   :  { %1031 = vmatprep.mubr.msk.f32.mxu0 %vm61_vm0, %v48_v23 }
  0x28   :  { %1032 = vmatmul.mubr.msk.f32.gmra.mrb[14].mxu0 %vm61_vm0, %v49_v24 }
  0xdf   :  { %v1012_v35 = vpop.f32.mrb[0].mxu0 }
  0xe0   :  { %v176_v36 = vpop.f32.mrb[1].mxu0  ;;  %v182_v38 = vadd.f32 %v1012_v35, %v856_v34 }
  0xe1   :  { %v177_v37 = vadd.f32 %v856_v34, %v176_v36 }
  0xe3   :  { %v1015_v39 = vpop.f32.mrb[2].mxu0  ;;  %1042 = vmatprep.mubr.msk.f32.mxu1 %vm61_vm0, %v177_v37 }
  0xe4   :  { %v192_v40 = vadd.f32 %v1015_v39, %v856_v34  ;;  %v186_v41 = vpop.f32.mrb[3].mxu0  ;;  %1043 = vmatmul.mubr.msk.f32.vlgmr.msra.gmra.mrb[0].mxu1 %vm61_vm0, %v182_v38 }
  0xe5   :  { %v187_v42 = vadd.f32 %v856_v34, %v186_v41 }
  0xe7   :  { %v1018_v43 = vpop.f32.mrb[4].mxu0  ;;  %1045 = vmatprep.mubr.msk.f32.mxu1 %vm61_vm0, %v187_v42 }
  0xe8   :  { %v202_v44 = vadd.f32 %v1018_v43, %v856_v34  ;;  %v196_v45 = vpop.f32.mrb[5].mxu0  ;;  %1046 = vmatmul.mubr.msk.f32.gmra.mrb[2].mxu1 %vm61_vm0, %v192_v40 }
  0xe9   :  { %v197_v46 = vadd.f32 %v856_v34, %v196_v45 }
  0xeb   :  { %v1021_v47 = vpop.f32.mrb[6].mxu0  ;;  %1048 = vmatprep.mubr.msk.f32.mxu1 %vm61_vm0, %v197_v46 }
  0xec   :  { %v212_v48 = vadd.f32 %v1021_v47, %v856_v34  ;;  %v206_v49 = vpop.f32.mrb[7].mxu0  ;;  %1049 = vmatmul.mubr.msk.f32.gmra.mrb[4].mxu1 %vm61_vm0, %v202_v44 }
  0xed   :  { %v207_v50 = vadd.f32 %v856_v34, %v206_v49 }
  0xef   :  { %v1024_v51 = vpop.f32.mrb[8].mxu0  ;;  %1051 = vmatprep.mubr.msk.f32.mxu1 %vm61_vm0, %v207_v50 }
  0xf0   :  { %v222_v52 = vadd.f32 %v1024_v51, %v856_v34  ;;  %v216_v53 = vpop.f32.mrb[9].mxu0  ;;  %1052 = vmatmul.mubr.msk.f32.gmra.mrb[6].mxu1 %vm61_vm0, %v212_v48 }
  0xf1   :  { %v217_v54 = vadd.f32 %v856_v34, %v216_v53  ;;  %v1223_v53 = vmov 0.0  }
  0xf3   :  { %v1027_v55 = vpop.f32.mrb[10].mxu0  ;;  %1054 = vmatprep.mubr.msk.f32.mxu1 %vm61_vm0, %v217_v54  ;;  %v1465_v54 = vld [vmem:[%s1553_s6] ss:$0 sm:$0xff] }
  0xf4   :  { %v232_v56 = vadd.f32 %v1027_v55, %v856_v34  ;;  %v226_v57 = vpop.f32.mrb[11].mxu0  ;;  %1055 = vmatmul.mubr.msk.f32.gmra.mrb[8].mxu1 %vm61_vm0, %v222_v52  ;;  %v1221_v52 = vmov 0.0|0.0  }
  0xf5   :  { %v227_v58 = vadd.f32 %v856_v34, %v226_v57  ;;  %1157 = vmatprep.subr.bf16.mxu1 %v1221_v52 }
  0xf7   :  { %v1030_v59 = vpop.f32.mrb[12].mxu0  ;;  %1057 = vmatprep.mubr.msk.f32.mxu1 %vm61_vm0, %v227_v58 }
  0xf8   :  { %v242_v60 = vadd.f32 %v1030_v59, %v856_v34  ;;  %v236_v61 = vpop.f32.mrb[13].mxu0  ;;  %1058 = vmatmul.mubr.msk.f32.gmra.mrb[10].mxu1 %vm61_vm0, %v232_v56 }
  0xf9   :  { %v237_v62 = vadd.f32 %v856_v34, %v236_v61 }
  0xfb   :  { %v1033_v63 = vpop.f32.mrb[14].mxu0  ;;  %1060 = vmatprep.mubr.msk.f32.mxu1 %vm61_vm0, %v237_v62 }
  0xfc   :  { %v252_v0 = vadd.f32 %v1033_v63, %v856_v34  ;;  %v246_v1 = vpop.f32.mrb[15].mxu0  ;;  %1061 = vmatmul.mubr.msk.f32.gmra.mrb[12].mxu1 %vm61_vm0, %v242_v60 }
  0xfd   :  { %v247_v2 = vadd.f32 %v856_v34, %v246_v1 }
  0xff   :  { %1063 = vmatprep.mubr.msk.f32.mxu1 %vm61_vm0, %v247_v2 }
 0x100   :  { %1064 = vmatmul.mubr.msk.f32.gmra.mrb[14].mxu1 %vm61_vm0, %v252_v0 }
 0x101   :  { %1130 = vmatprep.mubr.msk.f32.mxu1 %vm1222_vm1, %v1223_v53 }
 0x1b7   :  { %v1044_v4 = vpop.f32.mrb[0].mxu1 }
 0x1b8   :  { %v1397_v5 = vadd.f32 %v1044_v4, %v873_v3  ;;  %v380_v6 = vpop.f32.mrb[1].mxu1 }
 0x1b9   :  { %v1399_v7 = vadd.f32 %v873_v3, %v380_v6 }
 0x1ba   :  { %v460_v10 = vmax.f32 %v1397_v5, 0.0 }
 0x1bb   :  { %v459_v8 = vmax.f32 %v1399_v7, 0.0  ;;  %v1047_v9 = vpop.f32.mrb[2].mxu1 }
 0x1bc   :  { %v1403_v11 = vadd.f32 %v1047_v9, %v873_v3  ;;  %v390_v12 = vpop.f32.mrb[3].mxu1 }
 0x1bd   :  { %v1405_v13 = vadd.f32 %v873_v3, %v390_v12  ;;  %1074 = vmatprep.mubr.msk.f32.mxu0 %vm61_vm0, %v459_v8 }
 0x1be   :  { %v462_v14 = vmax.f32 %v1403_v11, 0.0  ;;  %1075 = vmatmul.mubr.msk.f32.vlgmr.msra.gmra.mrb[16].mxu0 %vm61_vm0, %v460_v10 }
 0x1bf   :  { %v461_v15 = vmax.f32 %v1405_v13, 0.0  ;;  %v1050_v16 = vpop.f32.mrb[4].mxu1 }
 0x1c0   :  { %v1411_v17 = vadd.f32 %v1050_v16, %v873_v3  ;;  %v400_v18 = vpop.f32.mrb[5].mxu1 }
 0x1c1   :  { %v1413_v19 = vadd.f32 %v873_v3, %v400_v18  ;;  %1077 = vmatprep.mubr.msk.f32.mxu0 %vm61_vm0, %v461_v15 }
 0x1c2   :  { %v464_v20 = vmax.f32 %v1411_v17, 0.0  ;;  %1078 = vmatmul.mubr.msk.f32.gmra.mrb[18].mxu0 %vm61_vm0, %v462_v14 }
 0x1c3   :  { %v463_v21 = vmax.f32 %v1413_v19, 0.0  ;;  %v1053_v22 = vpop.f32.mrb[6].mxu1 }
 0x1c4   :  { %v1419_v23 = vadd.f32 %v1053_v22, %v873_v3  ;;  %v410_v24 = vpop.f32.mrb[7].mxu1 }
 0x1c5   :  { %v1421_v25 = vadd.f32 %v873_v3, %v410_v24  ;;  %1080 = vmatprep.mubr.msk.f32.mxu0 %vm61_vm0, %v463_v21 }
 0x1c6   :  { %v466_v26 = vmax.f32 %v1419_v23, 0.0  ;;  %1081 = vmatmul.mubr.msk.f32.gmra.mrb[20].mxu0 %vm61_vm0, %v464_v20 }
 0x1c7   :  { %v465_v27 = vmax.f32 %v1421_v25, 0.0  ;;  %v1056_v28 = vpop.f32.mrb[8].mxu1 }
 0x1c8   :  { %v1427_v29 = vadd.f32 %v1056_v28, %v873_v3  ;;  %v420_v30 = vpop.f32.mrb[9].mxu1 }
 0x1c9   :  { %v1429_v31 = vadd.f32 %v873_v3, %v420_v30  ;;  %1083 = vmatprep.mubr.msk.f32.mxu0 %vm61_vm0, %v465_v27 }
 0x1ca   :  { %v468_v32 = vmax.f32 %v1427_v29, 0.0  ;;  %1084 = vmatmul.mubr.msk.f32.gmra.mrb[22].mxu0 %vm61_vm0, %v466_v26 }
 0x1cb   :  { %v467_v33 = vmax.f32 %v1429_v31, 0.0  ;;  %v1059_v34 = vpop.f32.mrb[10].mxu1 }
 0x1cc   :  { %v1435_v35 = vadd.f32 %v1059_v34, %v873_v3  ;;  %v430_v36 = vpop.f32.mrb[11].mxu1 }
 0x1cd   :  { %v1437_v37 = vadd.f32 %v873_v3, %v430_v36  ;;  %1086 = vmatprep.mubr.msk.f32.mxu0 %vm61_vm0, %v467_v33 }
 0x1ce   :  { %v470_v38 = vmax.f32 %v1435_v35, 0.0  ;;  %1087 = vmatmul.mubr.msk.f32.gmra.mrb[24].mxu0 %vm61_vm0, %v468_v32 }
 0x1cf   :  { %v469_v39 = vmax.f32 %v1437_v37, 0.0  ;;  %v1062_v40 = vpop.f32.mrb[12].mxu1 }
 0x1d0   :  { %v1443_v41 = vadd.f32 %v1062_v40, %v873_v3  ;;  %v440_v42 = vpop.f32.mrb[13].mxu1 }
 0x1d1   :  { %v1445_v43 = vadd.f32 %v873_v3, %v440_v42  ;;  %1089 = vmatprep.mubr.msk.f32.mxu0 %vm61_vm0, %v469_v39 }
 0x1d2   :  { %v472_v44 = vmax.f32 %v1443_v41, 0.0  ;;  %1090 = vmatmul.mubr.msk.f32.gmra.mrb[26].mxu0 %vm61_vm0, %v470_v38 }
 0x1d3   :  { %v471_v45 = vmax.f32 %v1445_v43, 0.0  ;;  %v1065_v46 = vpop.f32.mrb[14].mxu1 }
 0x1d4   :  { %v1451_v47 = vadd.f32 %v1065_v46, %v873_v3  ;;  %v450_v48 = vpop.f32.mrb[15].mxu1 }
 0x1d5   :  { %v1453_v49 = vadd.f32 %v873_v3, %v450_v48  ;;  %1092 = vmatprep.mubr.msk.f32.mxu0 %vm61_vm0, %v471_v45 }
 0x1d6   :  { %v474_v50 = vmax.f32 %v1451_v47, 0.0  ;;  %1093 = vmatmul.mubr.msk.f32.gmra.mrb[28].mxu0 %vm61_vm0, %v472_v44 }
 0x1d7   :  { %v473_v51 = vmax.f32 %v1453_v49, 0.0 }
 0x1d9   :  { %1095 = vmatprep.mubr.msk.f32.mxu0 %vm61_vm0, %v473_v51 }
 0x1da   :  { %1096 = vmatmul.mubr.msk.f32.gmra.mrb[30].mxu0 %vm61_vm0, %v474_v50 }
 0x291   :  { %v1076_v55 = vpop.f32.mrb[16].mxu0 }
 0x292   :  { %v606_v56 = vadd.f32 %v1076_v55, %v1465_v54  ;;  %v600_v57 = vpop.f32.mrb[17].mxu0 }
 0x293   :  { %v601_v58 = vadd.f32 %v1465_v54, %v600_v57 }
 0x294   :  { %v680_v59 = vadd.f32 %v606_v56, %v1397_v5 }
 0x295   :  { %v679_v60 = vadd.f32 %v601_v58, %v1399_v7  ;;  %v1079_v61 = vpop.f32.mrb[18].mxu0 }
 0x296   :  { %v696_v62 = vmax.f32 %v680_v59, 0.0  ;;  %v616_v63 = vadd.f32 %v1079_v61, %v1465_v54  ;;  %v610_v0 = vpop.f32.mrb[19].mxu0 }
 0x297   :  { %v695_v1 = vmax.f32 %v679_v60, 0.0  ;;  %v611_v2 = vadd.f32 %v1465_v54, %v610_v0 }
 0x298   :  { %v682_v3 = vadd.f32 %v616_v63, %v1403_v11 }
 0x299   :  { %v1158_v6 = vpack.c.bf16 %v696_v62, %v695_v1  ;;  %v681_v5 = vadd.f32 %v611_v2, %v1405_v13  ;;  %v1082_v7 = vpop.f32.mrb[20].mxu0 }
 0x29a   :  { %v698_v8 = vmax.f32 %v682_v3, 0.0  ;;  %v626_v9 = vadd.f32 %v1082_v7, %v1465_v54  ;;  %v620_v10 = vpop.f32.mrb[21].mxu0 }
 0x29b   :  { %v697_v12 = vmax.f32 %v681_v5, 0.0  ;;  %v621_v14 = vadd.f32 %v1465_v54, %v620_v10  ;;  %1160 = vmatpush3.bf16.xpose.msk.msra.mxu1 %vm1476_vm2, %v1158_v6 }
 0x29c   :  { %v684_v11 = vadd.f32 %v626_v9, %v1411_v17  ;;  %1161 = vmatprep.subr.bf16.mxu1 %v1221_v52 }
 0x29d   :  { %v1162_v15 = vpack.c.bf16 %v698_v8, %v697_v12  ;;  %v683_v16 = vadd.f32 %v621_v14, %v1413_v19  ;;  %v1085_v18 = vpop.f32.mrb[22].mxu0 }
 0x29e   :  { %v700_v13 = vmax.f32 %v684_v11, 0.0  ;;  %v636_v20 = vadd.f32 %v1085_v18, %v1465_v54  ;;  %v630_v21 = vpop.f32.mrb[23].mxu0 }
 0x29f   :  { %v699_v22 = vmax.f32 %v683_v16, 0.0  ;;  %v631_v24 = vadd.f32 %v1465_v54, %v630_v21 }
 0x2a0   :  { %v686_v26 = vadd.f32 %v636_v20, %v1419_v23 }
 0x2a1   :  { %v1166_v27 = vpack.c.bf16 %v700_v13, %v699_v22  ;;  %v685_v28 = vadd.f32 %v631_v24, %v1421_v25  ;;  %v1088_v30 = vpop.f32.mrb[24].mxu0 }
 0x2a2   :  { %v702_v17 = vmax.f32 %v686_v26, 0.0  ;;  %v646_v32 = vadd.f32 %v1088_v30, %v1465_v54  ;;  %v640_v33 = vpop.f32.mrb[25].mxu0 }
 0x2a3   :  { %v701_v34 = vmax.f32 %v685_v28, 0.0  ;;  %v641_v19 = vadd.f32 %v1465_v54, %v640_v33  ;;  %1164 = vmatpush3.bf16.xpose.msk.msra.mxu1 %vm1476_vm2, %v1162_v15 }
 0x2a4   :  { %v688_v36 = vadd.f32 %v646_v32, %v1427_v29  ;;  %1165 = vmatprep.subr.bf16.mxu1 %v1221_v52 }
 0x2a5   :  { %v1170_v38 = vpack.c.bf16 %v702_v17, %v701_v34  ;;  %v687_v23 = vadd.f32 %v641_v19, %v1429_v31  ;;  %v1091_v39 = vpop.f32.mrb[26].mxu0 }
 0x2a6   :  { %v704_v25 = vmax.f32 %v688_v36, 0.0  ;;  %v656_v40 = vadd.f32 %v1091_v39, %v1465_v54  ;;  %v650_v42 = vpop.f32.mrb[27].mxu0 }
 0x2a7   :  { %v703_v44 = vmax.f32 %v687_v23, 0.0  ;;  %v651_v45 = vadd.f32 %v1465_v54, %v650_v42 }
 0x2a8   :  { %v690_v46 = vadd.f32 %v656_v40, %v1435_v35 }
 0x2a9   :  { %v1174_v48 = vpack.c.bf16 %v704_v25, %v703_v44  ;;  %v689_v50 = vadd.f32 %v651_v45, %v1437_v37  ;;  %v1094_v51 = vpop.f32.mrb[28].mxu0 }
 0x2aa   :  { %v706_v29 = vmax.f32 %v690_v46, 0.0  ;;  %v666_v53 = vadd.f32 %v1094_v51, %v1465_v54  ;;  %v660_v55 = vpop.f32.mrb[29].mxu0 }
 0x2ab   :  { %v705_v56 = vmax.f32 %v689_v50, 0.0  ;;  %v661_v31 = vadd.f32 %v1465_v54, %v660_v55  ;;  %1168 = vmatpush3.bf16.xpose.msk.msra.mxu1 %vm1476_vm2, %v1166_v27 }
 0x2ac   :  { %v692_v57 = vadd.f32 %v666_v53, %v1443_v41  ;;  %1169 = vmatprep.subr.bf16.mxu1 %v1221_v52 }
 0x2ad   :  { %v1178_v58 = vpack.c.bf16 %v706_v29, %v705_v56  ;;  %v691_v35 = vadd.f32 %v661_v31, %v1445_v43  ;;  %v1097_v59 = vpop.f32.mrb[30].mxu0 }
 0x2ae   :  { %v708_v37 = vmax.f32 %v692_v57, 0.0  ;;  %v676_v60 = vadd.f32 %v1097_v59, %v1465_v54  ;;  %v670_v61 = vpop.f32.mrb[31].mxu0 }
 0x2af   :  { %v707_v62 = vmax.f32 %v691_v35, 0.0  ;;  %v671_v63 = vadd.f32 %v1465_v54, %v670_v61 }
 0x2b0   :  { %v694_v0 = vadd.f32 %v676_v60, %v1451_v47  ;;  %v711_v47 = vld [vmem:[%s1554_s7] sm:$0x1]  ;;  %s1197_s7 = scalar_lea.vmem %s849_s25, 16 }
 0x2b1   :  { %v1182_v1 = vpack.c.bf16 %v708_v37, %v707_v62  ;;  %v693_v2 = vadd.f32 %v671_v63, %v1453_v49  ;;  %v713_v49 = vstv %s1555_s8  ;;  %p1198_p0 = scmp.ne.s32.totalorder %s849_s25, %s1197_s7  ;;  %p1203_p2 = scmp.lt.s32.totalorder %s1201_s26, %s1197_s7 }
 0x2b2   :  { %v710_v3 = vmax.f32 %v694_v0, 0.0 }
 0x2b3   :  { %v709_v41 = vmax.f32 %v693_v2, 0.0  ;;  %1172 = vmatpush3.bf16.xpose.msk.msra.mxu1 %vm1476_vm2, %v1170_v38  ;;  %p1204_p3 = por %p1203_p2, %p1202_p1 }
 0x2b4   :  { %1173 = vmatprep.subr.bf16.mxu1 %v1221_v52 }
 0x2b5   :  { %v1186_v43 = vpack.c.bf16 %v710_v3, %v709_v41  ;;  %p1205_p4 = pnand %p1204_p3, %p1198_p0 }
 0x2bb   :  { %1176 = vmatpush3.bf16.xpose.msk.msra.mxu1 %vm1476_vm2, %v1174_v48 }
 0x2bc   :  { %1177 = vmatprep.subr.bf16.mxu1 %v1221_v52 }
 0x2c3   :  { %1180 = vmatpush3.bf16.xpose.msk.msra.mxu1 %vm1476_vm2, %v1178_v58 }
 0x2c4   :  { %1181 = vmatprep.subr.bf16.mxu1 %v1221_v52 }
 0x2cb   :  { %1184 = vmatpush3.bf16.xpose.msk.msra.mxu1 %vm1476_vm2, %v1182_v1 }
 0x2cc   :  { %1185 = vmatprep.subr.bf16.mxu1 %v1221_v52 }
 0x2d3   :  { %1188 = vmatpush3.bf16.xpose.msk.msra.mxu1 %vm1476_vm2, %v1186_v43 }
 0x2da   :  { %1131 = vmatmul.mubr.msk.f32.vlgmr.msra.gmra.mrb[16].mxu1 %vm61_vm0, %v711_v47 }
 0x3ad   :  { %v831_v54 = vpop.f32.mrb[16].mxu1 }
 0x3ae   :  { %v832_v6 = vadd.f32 %v831_v54, %v713_v49  ;;  %v1132_v5 = vpop.f32.mrb[17].mxu1 }
 0x3b0   :  { %v924_v7 = vmul.f32 -1.442695, %v832_v6 }
 0x3b2   :  { %1193 = vpow2.f32 %v924_v7 }
 0x3bc   :  { %v1194_v8 = vpop.eup %1193 }
 0x3bd   :  { %v838_v52 = vadd.f32 1.0, %v1194_v8 }
 0x3bf   :  { %1195 = vrcp.f32 %v838_v52 }
 0x3c9   :  { %v1196_v4 = vpop.eup %1195 }
 0x3ca   :  { %841 = vst [vmem:[#allocation3] sm:$0x1] %v1196_v4 }
 0x3cb   :  { %1208 = shalt.err (!%p1205_p4)
}
 0x3cc   :  { %s1209_s28 = scalar_lea.hbm %s1556_s9, 16 }
 0x3cd   :  { %p1210_p5 = scmp.ne.s32.totalorder %s1556_s9, %s1209_s28  ;;  %p1213_p6 = scmp.lt.u32.totalorder %s1209_s28, %s1556_s9 }
 0x3cf   :  { %p1215_p7 = pnand %p1213_p6, %p1210_p5 }
 0x3d1   :  { %1218 = shalt.err (!%p1215_p7)
}
 0x3d2   :  { %851 = dma.vmem_to_hbm [thread:$0]  %s849_s25, 16, %s1556_s9, [#allocation4]  }
 0x3d3   :  { %1219 = dma.done.wait [#allocation4], 16  }
 0x3d4   :  { %1220 = vsyncadd [#allocation4], 4294967280 }
 0x3d5   :  { %855 = vsyncpa [#allocation4], 1 }

</bundles_post_ra>
